<compile_context>
chip_gen: v5e
topology: v5e:2x2
jax: 0.10.0
libtpu: 0.0.40
codegen_flags: <defaults>
</compile_context>

<pallas_src>
import jax
import jax.numpy as jnp
from jax.experimental import pallas as pl
from jax.experimental.pallas import tpu as pltpu


def _seq_disc_kernel(x_ref,            # (T*B, Din)  time-major flattened, bf16
                     wih_ref,          # (Din, 4H)   W_ih^T bf16, cols [i,f,o|2g]
                     whh_ref,          # (H, 4H)     W_hh^T bf16, cols [i,f,o|2g]
                     b_ref,            # (1, 4H)     b_ih+b_hh f32, same ordering
                     w1_ref, b1_ref,   # (H, C) bf16, (1, C) f32
                     w2_ref, b2_ref,   # (C, C) bf16, (1, C) f32
                     w3_ref, b3_ref,   # (1, C) f32 row, (1, 1) f32
                     h_out_ref,        # (B, H)  final hidden state (f32)
                     logit_ref):       # (B, 1)  classifier logit (f32)
    TB, _ = x_ref.shape
    H = whh_ref.shape[0]
    B = h_out_ref.shape[0]
    T = TB // B

    # --- Hoisted input projection: ONE MXU call for all T timesteps ----------
    # bf16 operands, f32 accumulation; no in-kernel reshape needed.
    gates_x = (jnp.dot(x_ref[...], wih_ref[...],
                       preferred_element_type=jnp.float32)
               + b_ref[...])                                   # (T*B, 4H) f32

    whh = whh_ref[...]                                         # (H, 4H) bf16

    # --- Recurrence: h/c live in vregs, fully unrolled (T static) ------------
    h = jnp.zeros((B, H), jnp.float32)
    c = jnp.zeros((B, H), jnp.float32)
    for t in range(T):
        # Time-major layout => contiguous static sublane slice per step.
        gates = gates_x[t * B:(t + 1) * B, :] + jnp.dot(
            h.astype(jnp.bfloat16), whh, preferred_element_type=jnp.float32)
        # One EUP push over the full (B, 4H): g-gate columns were pre-scaled by
        # 2 host-side so tanh(x) = 2*sigmoid(2x) - 1 rides the same sigmoid.
        sig = jax.nn.sigmoid(gates)
        i_g = sig[:, 0 * H:1 * H]
        f_g = sig[:, 1 * H:2 * H]
        o_g = sig[:, 2 * H:3 * H]
        g_g = 2.0 * sig[:, 3 * H:] - 1.0
        c = f_g * c + i_g * g_g
        h = o_g * jnp.tanh(c)

    h_out_ref[...] = h

    # --- Classifier: Linear -> ReLU -> Linear -> ReLU -> (C -> 1) ------------
    z = jnp.maximum(
        jnp.dot(h.astype(jnp.bfloat16), w1_ref[...],
                preferred_element_type=jnp.float32) + b1_ref[...], 0.0)
    z = jnp.maximum(
        jnp.dot(z.astype(jnp.bfloat16), w2_ref[...],
                preferred_element_type=jnp.float32) + b2_ref[...], 0.0)
    # Final 1-wide projection as a lane reduction (free VPU/XLU slots) instead
    # of a 1-lane MXU matmul + masked store.
    logit_ref[...] = (jnp.sum(z * w3_ref[...], axis=-1, keepdims=True)
                      + b3_ref[...])


def _prep_gate_cols(w):
    """PyTorch gate column order [i, f, g, o] -> kernel order [i, f, o, g],
    with the g block pre-scaled by 2 (tanh folded into the sigmoid)."""
    H = w.shape[-1] // 4
    return jnp.concatenate(
        [w[..., :2 * H], w[..., 3 * H:], 2.0 * w[..., 2 * H:3 * H]], axis=-1)


@jax.jit
def sequence_disc_forward(x, params):
    """x: (B, T, n_in) batch-first (like the PyTorch module, input_type='poses').

    Returns (out, fmap_out) with out: (1, B, 1) and fmap_out = [h_n (1, B, H)].
    """
    B, T, Din = x.shape
    H = params["w_hh"].shape[0]          # w_hh stored pre-transposed as (H, 4H)

    # Layout plumbing in the wrapper (free at XLA level, not in the kernel):
    #   batch-first (B, T, Din) -> time-major flat (T*B, Din), bf16 MXU operand.
    x_tm = jnp.transpose(x.astype(jnp.float32), (1, 0, 2)).reshape(T * B, Din)
    x_tm = x_tm.astype(jnp.bfloat16)

    wih = _prep_gate_cols(params["w_ih"]).astype(jnp.bfloat16)
    whh = _prep_gate_cols(params["w_hh"]).astype(jnp.bfloat16)
    b_rnn = _prep_gate_cols(params["b_rnn"])                 # f32 (VPU add)
    w1 = params["w1"].astype(jnp.bfloat16)
    w2 = params["w2"].astype(jnp.bfloat16)
    w3_row = params["w3"].reshape(1, -1)                     # (1, C) f32 for VPU

    vmem = pl.BlockSpec(memory_space=pltpu.MemorySpace.VMEM)

    h_n, logit = pl.pallas_call(
        _seq_disc_kernel,
        out_shape=(
            jax.ShapeDtypeStruct((B, H), jnp.float32),
            jax.ShapeDtypeStruct((B, 1), jnp.float32),
        ),
        in_specs=[vmem] * 10,
        out_specs=(vmem, vmem),
    )(
        x_tm,
        wih, whh, b_rnn,
        w1, params["b1"],
        w2, params["b2"],
        w3_row, params["b3"],
    )

    out = logit[None]          # (1, B, 1)  -- classifier applied to hidden[0]
    fmap_out = [h_n[None]]     # [(1, B, H)]
    return out, fmap_out


def _reference_forward(x, params):
    """Pure-JAX f32 reference of the same forward (canonical [i,f,g,o] order)."""
    x = x.astype(jnp.float32)
    B, T, Din = x.shape
    H = params["w_hh"].shape[0]
    h = jnp.zeros((B, H), jnp.float32)
    c = jnp.zeros((B, H), jnp.float32)
    for t in range(T):
        gates = x[:, t] @ params["w_ih"] + h @ params["w_hh"] + params["b_rnn"]
        i_g = jax.nn.sigmoid(gates[:, 0 * H:1 * H])
        f_g = jax.nn.sigmoid(gates[:, 1 * H:2 * H])
        g_g = jnp.tanh(gates[:, 2 * H:3 * H])
        o_g = jax.nn.sigmoid(gates[:, 3 * H:4 * H])
        c = f_g * c + i_g * g_g
        h = o_g * jnp.tanh(c)
    z = jnp.maximum(h @ params["w1"] + params["b1"], 0.0)
    z = jnp.maximum(z @ params["w2"] + params["b2"], 0.0)
    logit = z @ params["w3"] + params["b3"]
    return logit[None], [h[None]]


def init_params(key, n_in, dim_hidden_rnn, dim_hidden_class):
    """Deterministic synthetic parameters (shapes match the nn.Module).

    LSTM weights are stored pre-transposed as (in, 4H) in canonical PyTorch gate
    order [i, f, g, o]; the wrapper permutes/scales columns for the kernel.
    """
    H, C = dim_hidden_rnn, dim_hidden_class
    ks = jax.random.split(key, 10)
    s_rnn = 1.0 / jnp.sqrt(H)

    def u(k, shape, s):
        return jax.random.uniform(k, shape, jnp.float32, -s, s)

    w_ih = u(ks[0], (n_in, 4 * H), s_rnn)
    w_hh = u(ks[1], (H, 4 * H), s_rnn)
    b_rnn = u(ks[2], (1, 4 * H), s_rnn) + u(ks[3], (1, 4 * H), s_rnn)  # b_ih+b_hh

    def xavier(k, fan_in, fan_out):
        bound = jnp.sqrt(6.0 / (fan_in + fan_out))
        return jax.random.uniform(k, (fan_in, fan_out), jnp.float32, -bound, bound)

    w1 = xavier(ks[4], H, C)
    b1 = u(ks[5], (1, C), 1.0 / jnp.sqrt(H))
    w2 = xavier(ks[6], C, C)
    b2 = u(ks[7], (1, C), 1.0 / jnp.sqrt(C))
    w3 = u(ks[8], (C, 1), 1.0 / jnp.sqrt(C))
    b3 = u(ks[9], (1, 1), 1.0 / jnp.sqrt(C))

    return dict(w_ih=w_ih, w_hh=w_hh, b_rnn=b_rnn,
                w1=w1, b1=b1, w2=w2, b2=b2, w3=w3, b3=b3)


if __name__ == "__main__":
    # Small shapes consistent with Sequence_disc(n_in=32, dim_hidden_rnn=32,
    # n_layers_class=2, dim_hidden_class=32), input_type='poses', lstm, 1 layer.
    # TODO(synk): other input_type variants ('changes'/'angles'/'translation'),
    # GRU architecture, multi-layer RNN and the BCE/fmap losses are not part of
    # this forward-pass kernel.
    B, T, N_IN = 2, 8, 32
    H, C = 32, 32

    key = jax.random.PRNGKey(0)
    k_x, k_p = jax.random.split(key)
    x = jax.random.normal(k_x, (B, T, N_IN), jnp.float32)
    params = init_params(k_p, N_IN, H, C)

    out, fmap_out = sequence_disc_forward(x, params)
    out = jax.block_until_ready(out)
    h_n = jax.block_until_ready(fmap_out[0])

    # Sanity-check against a pure-f32 JAX reference.  Tolerance accounts for the
    # bf16 MXU operands (weights/x cast to bf16, f32 accumulation) in the kernel.
    ref_out, ref_fmap = _reference_forward(x, params)
    assert out.shape == (1, B, 1) and h_n.shape == (1, B, H)
    assert jnp.allclose(out, ref_out, atol=3e-2, rtol=3e-2)
    assert jnp.allclose(h_n, ref_fmap[0], atol=3e-2, rtol=3e-2)

    print("KERNEL_OK")
</pallas_src>

<mosaic_0001>
module attributes {stable_mosaic.version = 11 : i64} {
  func.func @_seq_disc_kernel(%arg0: memref<16x32xbf16, #tpu.memory_space<vmem>>, %arg1: memref<32x128xbf16, #tpu.memory_space<vmem>>, %arg2: memref<32x128xbf16, #tpu.memory_space<vmem>>, %arg3: memref<1x128xf32, #tpu.memory_space<vmem>>, %arg4: memref<32x32xbf16, #tpu.memory_space<vmem>>, %arg5: memref<1x32xf32, #tpu.memory_space<vmem>>, %arg6: memref<32x32xbf16, #tpu.memory_space<vmem>>, %arg7: memref<1x32xf32, #tpu.memory_space<vmem>>, %arg8: memref<1x32xf32, #tpu.memory_space<vmem>>, %arg9: memref<1x1xf32, #tpu.memory_space<vmem>>, %arg10: memref<2x32xf32, #tpu.memory_space<vmem>>, %arg11: memref<2x1xf32, #tpu.memory_space<vmem>>) attributes {dimension_semantics = [], scalar_prefetch = 0 : i64, scratch_operands = 0 : i64, tpu.core_type = #tpu.core_type<tc>} {
    %c0 = arith.constant 0 : index
    %c0_0 = arith.constant 0 : index
    %0 = vector.load %arg0[%c0, %c0_0] : memref<16x32xbf16, #tpu.memory_space<vmem>>, vector<16x32xbf16>
    %c0_1 = arith.constant 0 : index
    %c0_2 = arith.constant 0 : index
    %1 = vector.load %arg1[%c0_1, %c0_2] : memref<32x128xbf16, #tpu.memory_space<vmem>>, vector<32x128xbf16>
    %cst = arith.constant dense<0.000000e+00> : vector<16x128xf32>
    %2 = tpu.matmul %0, %1, %cst {dimension_numbers = #tpu.dot_dimension_numbers<[1], [0], [0], [1], [0, 0, 1, 1], [], []>} : vector<16x32xbf16>, vector<32x128xbf16>, vector<16x128xf32> -> vector<16x128xf32>
    %c0_3 = arith.constant 0 : index
    %c0_4 = arith.constant 0 : index
    %3 = vector.load %arg3[%c0_3, %c0_4] : memref<1x128xf32, #tpu.memory_space<vmem>>, vector<1x128xf32>
    %4 = vector.broadcast %3 : vector<1x128xf32> to vector<16x128xf32>
    %5 = arith.addf %2, %4 : vector<16x128xf32>
    %c0_5 = arith.constant 0 : index
    %c0_6 = arith.constant 0 : index
    %6 = vector.load %arg2[%c0_5, %c0_6] : memref<32x128xbf16, #tpu.memory_space<vmem>>, vector<32x128xbf16>
    %cst_7 = arith.constant 0.000000e+00 : f32
    %7 = vector.broadcast %cst_7 : f32 to vector<2x32xf32>
    %cst_8 = arith.constant 0.000000e+00 : f32
    %8 = vector.broadcast %cst_8 : f32 to vector<2x32xf32>
    %9 = vector.extract_strided_slice %5 {offsets = [0, 0], sizes = [2, 128], strides = [1, 1]} : vector<16x128xf32> to vector<2x128xf32>
    %10 = arith.truncf %7 : vector<2x32xf32> to vector<2x32xbf16>
    %cst_9 = arith.constant dense<0.000000e+00> : vector<2x128xf32>
    %11 = tpu.matmul %10, %6, %cst_9 {dimension_numbers = #tpu.dot_dimension_numbers<[1], [0], [0], [1], [0, 0, 1, 1], [], []>} : vector<2x32xbf16>, vector<32x128xbf16>, vector<2x128xf32> -> vector<2x128xf32>
    %12 = arith.addf %9, %11 : vector<2x128xf32>
    %13 = arith.negf %12 : vector<2x128xf32>
    %14 = math.exp %13 : vector<2x128xf32>
    %cst_10 = arith.constant 1.000000e+00 : f32
    %15 = vector.broadcast %cst_10 : f32 to vector<2x128xf32>
    %16 = arith.addf %15, %14 : vector<2x128xf32>
    %17 = arith.divf %15, %16 : vector<2x128xf32>
    %18 = vector.extract_strided_slice %17 {offsets = [0, 0], sizes = [2, 32], strides = [1, 1]} : vector<2x128xf32> to vector<2x32xf32>
    %19 = vector.extract_strided_slice %17 {offsets = [0, 32], sizes = [2, 32], strides = [1, 1]} : vector<2x128xf32> to vector<2x32xf32>
    %20 = vector.extract_strided_slice %17 {offsets = [0, 64], sizes = [2, 32], strides = [1, 1]} : vector<2x128xf32> to vector<2x32xf32>
    %21 = vector.extract_strided_slice %17 {offsets = [0, 96], sizes = [2, 32], strides = [1, 1]} : vector<2x128xf32> to vector<2x32xf32>
    %cst_11 = arith.constant 2.000000e+00 : f32
    %22 = vector.broadcast %cst_11 : f32 to vector<2x32xf32>
    %23 = arith.mulf %22, %21 : vector<2x32xf32>
    %cst_12 = arith.constant 1.000000e+00 : f32
    %24 = vector.broadcast %cst_12 : f32 to vector<2x32xf32>
    %25 = arith.subf %23, %24 : vector<2x32xf32>
    %26 = arith.mulf %19, %8 : vector<2x32xf32>
    %27 = arith.mulf %18, %25 : vector<2x32xf32>
    %28 = arith.addf %26, %27 : vector<2x32xf32>
    %29 = math.tanh %28 : vector<2x32xf32>
    %30 = arith.mulf %20, %29 : vector<2x32xf32>
    %31 = vector.extract_strided_slice %5 {offsets = [2, 0], sizes = [2, 128], strides = [1, 1]} : vector<16x128xf32> to vector<2x128xf32>
    %32 = arith.truncf %30 : vector<2x32xf32> to vector<2x32xbf16>
    %cst_13 = arith.constant dense<0.000000e+00> : vector<2x128xf32>
    %33 = tpu.matmul %32, %6, %cst_13 {dimension_numbers = #tpu.dot_dimension_numbers<[1], [0], [0], [1], [0, 0, 1, 1], [], []>} : vector<2x32xbf16>, vector<32x128xbf16>, vector<2x128xf32> -> vector<2x128xf32>
    %34 = arith.addf %31, %33 : vector<2x128xf32>
    %35 = arith.negf %34 : vector<2x128xf32>
    %36 = math.exp %35 : vector<2x128xf32>
    %cst_14 = arith.constant 1.000000e+00 : f32
    %37 = vector.broadcast %cst_14 : f32 to vector<2x128xf32>
    %38 = arith.addf %37, %36 : vector<2x128xf32>
    %39 = arith.divf %37, %38 : vector<2x128xf32>
    %40 = vector.extract_strided_slice %39 {offsets = [0, 0], sizes = [2, 32], strides = [1, 1]} : vector<2x128xf32> to vector<2x32xf32>
    %41 = vector.extract_strided_slice %39 {offsets = [0, 32], sizes = [2, 32], strides = [1, 1]} : vector<2x128xf32> to vector<2x32xf32>
    %42 = vector.extract_strided_slice %39 {offsets = [0, 64], sizes = [2, 32], strides = [1, 1]} : vector<2x128xf32> to vector<2x32xf32>
    %43 = vector.extract_strided_slice %39 {offsets = [0, 96], sizes = [2, 32], strides = [1, 1]} : vector<2x128xf32> to vector<2x32xf32>
    %cst_15 = arith.constant 2.000000e+00 : f32
    %44 = vector.broadcast %cst_15 : f32 to vector<2x32xf32>
    %45 = arith.mulf %44, %43 : vector<2x32xf32>
    %cst_16 = arith.constant 1.000000e+00 : f32
    %46 = vector.broadcast %cst_16 : f32 to vector<2x32xf32>
    %47 = arith.subf %45, %46 : vector<2x32xf32>
    %48 = arith.mulf %41, %28 : vector<2x32xf32>
    %49 = arith.mulf %40, %47 : vector<2x32xf32>
    %50 = arith.addf %48, %49 : vector<2x32xf32>
    %51 = math.tanh %50 : vector<2x32xf32>
    %52 = arith.mulf %42, %51 : vector<2x32xf32>
    %53 = vector.extract_strided_slice %5 {offsets = [4, 0], sizes = [2, 128], strides = [1, 1]} : vector<16x128xf32> to vector<2x128xf32>
    %54 = arith.truncf %52 : vector<2x32xf32> to vector<2x32xbf16>
    %cst_17 = arith.constant dense<0.000000e+00> : vector<2x128xf32>
    %55 = tpu.matmul %54, %6, %cst_17 {dimension_numbers = #tpu.dot_dimension_numbers<[1], [0], [0], [1], [0, 0, 1, 1], [], []>} : vector<2x32xbf16>, vector<32x128xbf16>, vector<2x128xf32> -> vector<2x128xf32>
    %56 = arith.addf %53, %55 : vector<2x128xf32>
    %57 = arith.negf %56 : vector<2x128xf32>
    %58 = math.exp %57 : vector<2x128xf32>
    %cst_18 = arith.constant 1.000000e+00 : f32
    %59 = vector.broadcast %cst_18 : f32 to vector<2x128xf32>
    %60 = arith.addf %59, %58 : vector<2x128xf32>
    %61 = arith.divf %59, %60 : vector<2x128xf32>
    %62 = vector.extract_strided_slice %61 {offsets = [0, 0], sizes = [2, 32], strides = [1, 1]} : vector<2x128xf32> to vector<2x32xf32>
    %63 = vector.extract_strided_slice %61 {offsets = [0, 32], sizes = [2, 32], strides = [1, 1]} : vector<2x128xf32> to vector<2x32xf32>
    %64 = vector.extract_strided_slice %61 {offsets = [0, 64], sizes = [2, 32], strides = [1, 1]} : vector<2x128xf32> to vector<2x32xf32>
    %65 = vector.extract_strided_slice %61 {offsets = [0, 96], sizes = [2, 32], strides = [1, 1]} : vector<2x128xf32> to vector<2x32xf32>
    %cst_19 = arith.constant 2.000000e+00 : f32
    %66 = vector.broadcast %cst_19 : f32 to vector<2x32xf32>
    %67 = arith.mulf %66, %65 : vector<2x32xf32>
    %cst_20 = arith.constant 1.000000e+00 : f32
    %68 = vector.broadcast %cst_20 : f32 to vector<2x32xf32>
    %69 = arith.subf %67, %68 : vector<2x32xf32>
    %70 = arith.mulf %63, %50 : vector<2x32xf32>
    %71 = arith.mulf %62, %69 : vector<2x32xf32>
    %72 = arith.addf %70, %71 : vector<2x32xf32>
    %73 = math.tanh %72 : vector<2x32xf32>
    %74 = arith.mulf %64, %73 : vector<2x32xf32>
    %75 = vector.extract_strided_slice %5 {offsets = [6, 0], sizes = [2, 128], strides = [1, 1]} : vector<16x128xf32> to vector<2x128xf32>
    %76 = arith.truncf %74 : vector<2x32xf32> to vector<2x32xbf16>
    %cst_21 = arith.constant dense<0.000000e+00> : vector<2x128xf32>
    %77 = tpu.matmul %76, %6, %cst_21 {dimension_numbers = #tpu.dot_dimension_numbers<[1], [0], [0], [1], [0, 0, 1, 1], [], []>} : vector<2x32xbf16>, vector<32x128xbf16>, vector<2x128xf32> -> vector<2x128xf32>
    %78 = arith.addf %75, %77 : vector<2x128xf32>
    %79 = arith.negf %78 : vector<2x128xf32>
    %80 = math.exp %79 : vector<2x128xf32>
    %cst_22 = arith.constant 1.000000e+00 : f32
    %81 = vector.broadcast %cst_22 : f32 to vector<2x128xf32>
    %82 = arith.addf %81, %80 : vector<2x128xf32>
    %83 = arith.divf %81, %82 : vector<2x128xf32>
    %84 = vector.extract_strided_slice %83 {offsets = [0, 0], sizes = [2, 32], strides = [1, 1]} : vector<2x128xf32> to vector<2x32xf32>
    %85 = vector.extract_strided_slice %83 {offsets = [0, 32], sizes = [2, 32], strides = [1, 1]} : vector<2x128xf32> to vector<2x32xf32>
    %86 = vector.extract_strided_slice %83 {offsets = [0, 64], sizes = [2, 32], strides = [1, 1]} : vector<2x128xf32> to vector<2x32xf32>
    %87 = vector.extract_strided_slice %83 {offsets = [0, 96], sizes = [2, 32], strides = [1, 1]} : vector<2x128xf32> to vector<2x32xf32>
    %cst_23 = arith.constant 2.000000e+00 : f32
    %88 = vector.broadcast %cst_23 : f32 to vector<2x32xf32>
    %89 = arith.mulf %88, %87 : vector<2x32xf32>
    %cst_24 = arith.constant 1.000000e+00 : f32
    %90 = vector.broadcast %cst_24 : f32 to vector<2x32xf32>
    %91 = arith.subf %89, %90 : vector<2x32xf32>
    %92 = arith.mulf %85, %72 : vector<2x32xf32>
    %93 = arith.mulf %84, %91 : vector<2x32xf32>
    %94 = arith.addf %92, %93 : vector<2x32xf32>
    %95 = math.tanh %94 : vector<2x32xf32>
    %96 = arith.mulf %86, %95 : vector<2x32xf32>
    %97 = vector.extract_strided_slice %5 {offsets = [8, 0], sizes = [2, 128], strides = [1, 1]} : vector<16x128xf32> to vector<2x128xf32>
    %98 = arith.truncf %96 : vector<2x32xf32> to vector<2x32xbf16>
    %cst_25 = arith.constant dense<0.000000e+00> : vector<2x128xf32>
    %99 = tpu.matmul %98, %6, %cst_25 {dimension_numbers = #tpu.dot_dimension_numbers<[1], [0], [0], [1], [0, 0, 1, 1], [], []>} : vector<2x32xbf16>, vector<32x128xbf16>, vector<2x128xf32> -> vector<2x128xf32>
    %100 = arith.addf %97, %99 : vector<2x128xf32>
    %101 = arith.negf %100 : vector<2x128xf32>
    %102 = math.exp %101 : vector<2x128xf32>
    %cst_26 = arith.constant 1.000000e+00 : f32
    %103 = vector.broadcast %cst_26 : f32 to vector<2x128xf32>
    %104 = arith.addf %103, %102 : vector<2x128xf32>
    %105 = arith.divf %103, %104 : vector<2x128xf32>
    %106 = vector.extract_strided_slice %105 {offsets = [0, 0], sizes = [2, 32], strides = [1, 1]} : vector<2x128xf32> to vector<2x32xf32>
    %107 = vector.extract_strided_slice %105 {offsets = [0, 32], sizes = [2, 32], strides = [1, 1]} : vector<2x128xf32> to vector<2x32xf32>
    %108 = vector.extract_strided_slice %105 {offsets = [0, 64], sizes = [2, 32], strides = [1, 1]} : vector<2x128xf32> to vector<2x32xf32>
    %109 = vector.extract_strided_slice %105 {offsets = [0, 96], sizes = [2, 32], strides = [1, 1]} : vector<2x128xf32> to vector<2x32xf32>
    %cst_27 = arith.constant 2.000000e+00 : f32
    %110 = vector.broadcast %cst_27 : f32 to vector<2x32xf32>
    %111 = arith.mulf %110, %109 : vector<2x32xf32>
    %cst_28 = arith.constant 1.000000e+00 : f32
    %112 = vector.broadcast %cst_28 : f32 to vector<2x32xf32>
    %113 = arith.subf %111, %112 : vector<2x32xf32>
    %114 = arith.mulf %107, %94 : vector<2x32xf32>
    %115 = arith.mulf %106, %113 : vector<2x32xf32>
    %116 = arith.addf %114, %115 : vector<2x32xf32>
    %117 = math.tanh %116 : vector<2x32xf32>
    %118 = arith.mulf %108, %117 : vector<2x32xf32>
    %119 = vector.extract_strided_slice %5 {offsets = [10, 0], sizes = [2, 128], strides = [1, 1]} : vector<16x128xf32> to vector<2x128xf32>
    %120 = arith.truncf %118 : vector<2x32xf32> to vector<2x32xbf16>
    %cst_29 = arith.constant dense<0.000000e+00> : vector<2x128xf32>
    %121 = tpu.matmul %120, %6, %cst_29 {dimension_numbers = #tpu.dot_dimension_numbers<[1], [0], [0], [1], [0, 0, 1, 1], [], []>} : vector<2x32xbf16>, vector<32x128xbf16>, vector<2x128xf32> -> vector<2x128xf32>
    %122 = arith.addf %119, %121 : vector<2x128xf32>
    %123 = arith.negf %122 : vector<2x128xf32>
    %124 = math.exp %123 : vector<2x128xf32>
    %cst_30 = arith.constant 1.000000e+00 : f32
    %125 = vector.broadcast %cst_30 : f32 to vector<2x128xf32>
    %126 = arith.addf %125, %124 : vector<2x128xf32>
    %127 = arith.divf %125, %126 : vector<2x128xf32>
    %128 = vector.extract_strided_slice %127 {offsets = [0, 0], sizes = [2, 32], strides = [1, 1]} : vector<2x128xf32> to vector<2x32xf32>
    %129 = vector.extract_strided_slice %127 {offsets = [0, 32], sizes = [2, 32], strides = [1, 1]} : vector<2x128xf32> to vector<2x32xf32>
    %130 = vector.extract_strided_slice %127 {offsets = [0, 64], sizes = [2, 32], strides = [1, 1]} : vector<2x128xf32> to vector<2x32xf32>
    %131 = vector.extract_strided_slice %127 {offsets = [0, 96], sizes = [2, 32], strides = [1, 1]} : vector<2x128xf32> to vector<2x32xf32>
    %cst_31 = arith.constant 2.000000e+00 : f32
    %132 = vector.broadcast %cst_31 : f32 to vector<2x32xf32>
    %133 = arith.mulf %132, %131 : vector<2x32xf32>
    %cst_32 = arith.constant 1.000000e+00 : f32
    %134 = vector.broadcast %cst_32 : f32 to vector<2x32xf32>
    %135 = arith.subf %133, %134 : vector<2x32xf32>
    %136 = arith.mulf %129, %116 : vector<2x32xf32>
    %137 = arith.mulf %128, %135 : vector<2x32xf32>
    %138 = arith.addf %136, %137 : vector<2x32xf32>
    %139 = math.tanh %138 : vector<2x32xf32>
    %140 = arith.mulf %130, %139 : vector<2x32xf32>
    %141 = vector.extract_strided_slice %5 {offsets = [12, 0], sizes = [2, 128], strides = [1, 1]} : vector<16x128xf32> to vector<2x128xf32>
    %142 = arith.truncf %140 : vector<2x32xf32> to vector<2x32xbf16>
    %cst_33 = arith.constant dense<0.000000e+00> : vector<2x128xf32>
    %143 = tpu.matmul %142, %6, %cst_33 {dimension_numbers = #tpu.dot_dimension_numbers<[1], [0], [0], [1], [0, 0, 1, 1], [], []>} : vector<2x32xbf16>, vector<32x128xbf16>, vector<2x128xf32> -> vector<2x128xf32>
    %144 = arith.addf %141, %143 : vector<2x128xf32>
    %145 = arith.negf %144 : vector<2x128xf32>
    %146 = math.exp %145 : vector<2x128xf32>
    %cst_34 = arith.constant 1.000000e+00 : f32
    %147 = vector.broadcast %cst_34 : f32 to vector<2x128xf32>
    %148 = arith.addf %147, %146 : vector<2x128xf32>
    %149 = arith.divf %147, %148 : vector<2x128xf32>
    %150 = vector.extract_strided_slice %149 {offsets = [0, 0], sizes = [2, 32], strides = [1, 1]} : vector<2x128xf32> to vector<2x32xf32>
    %151 = vector.extract_strided_slice %149 {offsets = [0, 32], sizes = [2, 32], strides = [1, 1]} : vector<2x128xf32> to vector<2x32xf32>
    %152 = vector.extract_strided_slice %149 {offsets = [0, 64], sizes = [2, 32], strides = [1, 1]} : vector<2x128xf32> to vector<2x32xf32>
    %153 = vector.extract_strided_slice %149 {offsets = [0, 96], sizes = [2, 32], strides = [1, 1]} : vector<2x128xf32> to vector<2x32xf32>
    %cst_35 = arith.constant 2.000000e+00 : f32
    %154 = vector.broadcast %cst_35 : f32 to vector<2x32xf32>
    %155 = arith.mulf %154, %153 : vector<2x32xf32>
    %cst_36 = arith.constant 1.000000e+00 : f32
    %156 = vector.broadcast %cst_36 : f32 to vector<2x32xf32>
    %157 = arith.subf %155, %156 : vector<2x32xf32>
    %158 = arith.mulf %151, %138 : vector<2x32xf32>
    %159 = arith.mulf %150, %157 : vector<2x32xf32>
    %160 = arith.addf %158, %159 : vector<2x32xf32>
    %161 = math.tanh %160 : vector<2x32xf32>
    %162 = arith.mulf %152, %161 : vector<2x32xf32>
    %163 = vector.extract_strided_slice %5 {offsets = [14, 0], sizes = [2, 128], strides = [1, 1]} : vector<16x128xf32> to vector<2x128xf32>
    %164 = arith.truncf %162 : vector<2x32xf32> to vector<2x32xbf16>
    %cst_37 = arith.constant dense<0.000000e+00> : vector<2x128xf32>
    %165 = tpu.matmul %164, %6, %cst_37 {dimension_numbers = #tpu.dot_dimension_numbers<[1], [0], [0], [1], [0, 0, 1, 1], [], []>} : vector<2x32xbf16>, vector<32x128xbf16>, vector<2x128xf32> -> vector<2x128xf32>
    %166 = arith.addf %163, %165 : vector<2x128xf32>
    %167 = arith.negf %166 : vector<2x128xf32>
    %168 = math.exp %167 : vector<2x128xf32>
    %cst_38 = arith.constant 1.000000e+00 : f32
    %169 = vector.broadcast %cst_38 : f32 to vector<2x128xf32>
    %170 = arith.addf %169, %168 : vector<2x128xf32>
    %171 = arith.divf %169, %170 : vector<2x128xf32>
    %172 = vector.extract_strided_slice %171 {offsets = [0, 0], sizes = [2, 32], strides = [1, 1]} : vector<2x128xf32> to vector<2x32xf32>
    %173 = vector.extract_strided_slice %171 {offsets = [0, 32], sizes = [2, 32], strides = [1, 1]} : vector<2x128xf32> to vector<2x32xf32>
    %174 = vector.extract_strided_slice %171 {offsets = [0, 64], sizes = [2, 32], strides = [1, 1]} : vector<2x128xf32> to vector<2x32xf32>
    %175 = vector.extract_strided_slice %171 {offsets = [0, 96], sizes = [2, 32], strides = [1, 1]} : vector<2x128xf32> to vector<2x32xf32>
    %cst_39 = arith.constant 2.000000e+00 : f32
    %176 = vector.broadcast %cst_39 : f32 to vector<2x32xf32>
    %177 = arith.mulf %176, %175 : vector<2x32xf32>
    %cst_40 = arith.constant 1.000000e+00 : f32
    %178 = vector.broadcast %cst_40 : f32 to vector<2x32xf32>
    %179 = arith.subf %177, %178 : vector<2x32xf32>
    %180 = arith.mulf %173, %160 : vector<2x32xf32>
    %181 = arith.mulf %172, %179 : vector<2x32xf32>
    %182 = arith.addf %180, %181 : vector<2x32xf32>
    %183 = math.tanh %182 : vector<2x32xf32>
    %184 = arith.mulf %174, %183 : vector<2x32xf32>
    %c0_41 = arith.constant 0 : index
    %c0_42 = arith.constant 0 : index
    %185 = vector.load %arg10[%c0_41, %c0_42] : memref<2x32xf32, #tpu.memory_space<vmem>>, vector<2x32xf32>
    tpu.vector_store %arg10[%c0_41, %c0_42], %184 {strides = array<i32>} : memref<2x32xf32, #tpu.memory_space<vmem>>, vector<2x32xf32>,
    %186 = arith.truncf %184 : vector<2x32xf32> to vector<2x32xbf16>
    %c0_43 = arith.constant 0 : index
    %c0_44 = arith.constant 0 : index
    %187 = vector.load %arg4[%c0_43, %c0_44] : memref<32x32xbf16, #tpu.memory_space<vmem>>, vector<32x32xbf16>
    %cst_45 = arith.constant dense<0.000000e+00> : vector<2x32xf32>
    %188 = tpu.matmul %186, %187, %cst_45 {dimension_numbers = #tpu.dot_dimension_numbers<[1], [0], [0], [1], [0, 0, 1, 1], [], []>} : vector<2x32xbf16>, vector<32x32xbf16>, vector<2x32xf32> -> vector<2x32xf32>
    %c0_46 = arith.constant 0 : index
    %c0_47 = arith.constant 0 : index
    %189 = vector.load %arg5[%c0_46, %c0_47] : memref<1x32xf32, #tpu.memory_space<vmem>>, vector<1x32xf32>
    %190 = vector.broadcast %189 : vector<1x32xf32> to vector<2x32xf32>
    %191 = arith.addf %188, %190 : vector<2x32xf32>
    %cst_48 = arith.constant 0.000000e+00 : f32
    %192 = vector.broadcast %cst_48 : f32 to vector<2x32xf32>
    %193 = arith.maximumf %191, %192 : vector<2x32xf32>
    %194 = arith.truncf %193 : vector<2x32xf32> to vector<2x32xbf16>
    %c0_49 = arith.constant 0 : index
    %c0_50 = arith.constant 0 : index
    %195 = vector.load %arg6[%c0_49, %c0_50] : memref<32x32xbf16, #tpu.memory_space<vmem>>, vector<32x32xbf16>
    %cst_51 = arith.constant dense<0.000000e+00> : vector<2x32xf32>
    %196 = tpu.matmul %194, %195, %cst_51 {dimension_numbers = #tpu.dot_dimension_numbers<[1], [0], [0], [1], [0, 0, 1, 1], [], []>} : vector<2x32xbf16>, vector<32x32xbf16>, vector<2x32xf32> -> vector<2x32xf32>
    %c0_52 = arith.constant 0 : index
    %c0_53 = arith.constant 0 : index
    %197 = vector.load %arg7[%c0_52, %c0_53] : memref<1x32xf32, #tpu.memory_space<vmem>>, vector<1x32xf32>
    %198 = vector.broadcast %197 : vector<1x32xf32> to vector<2x32xf32>
    %199 = arith.addf %196, %198 : vector<2x32xf32>
    %cst_54 = arith.constant 0.000000e+00 : f32
    %200 = vector.broadcast %cst_54 : f32 to vector<2x32xf32>
    %201 = arith.maximumf %199, %200 : vector<2x32xf32>
    %c0_55 = arith.constant 0 : index
    %c0_56 = arith.constant 0 : index
    %202 = vector.load %arg8[%c0_55, %c0_56] : memref<1x32xf32, #tpu.memory_space<vmem>>, vector<1x32xf32>
    %203 = vector.broadcast %202 : vector<1x32xf32> to vector<2x32xf32>
    %204 = arith.mulf %201, %203 : vector<2x32xf32>
    %cst_57 = arith.constant dense<0.000000e+00> : vector<2xf32>
    %205 = vector.multi_reduction <add>, %204, %cst_57 [1] : vector<2x32xf32> to vector<2xf32>
    %206 = vector.shape_cast %205 : vector<2xf32> to vector<2x1xf32>
    %c0_58 = arith.constant 0 : index
    %c0_59 = arith.constant 0 : index
    %207 = vector.load %arg9[%c0_58, %c0_59] : memref<1x1xf32, #tpu.memory_space<vmem>>, vector<1x1xf32>
    %208 = vector.broadcast %207 : vector<1x1xf32> to vector<2x1xf32>
    %209 = arith.addf %206, %208 : vector<2x1xf32>
    %c0_60 = arith.constant 0 : index
    %c0_61 = arith.constant 0 : index
    %210 = vector.load %arg11[%c0_60, %c0_61] : memref<2x1xf32, #tpu.memory_space<vmem>>, vector<2x1xf32>
    tpu.vector_store %arg11[%c0_60, %c0_61], %209 {strides = array<i32>} : memref<2x1xf32, #tpu.memory_space<vmem>>, vector<2x1xf32>,
    return
  }
}

</mosaic_0001>

<bundles_post_ra>
// kernel: sequence_disc_forward.1
= control target key start
LH: loop header
LB: loop body
LE: loop exit
PB: predicated region body
PF: predicated region fallthrough
CT: control target
= control target key end

     0   :  { %s1061_s0 = inlined_call_operand.vmem [shape: bf16[16,32], index: 0, kind: input, shape index: {}]   ;;  %s1062_s1 = inlined_call_operand.vmem [shape: bf16[32,128], index: 1, kind: input, shape index: {}]   ;;  %s1063_s2 = inlined_call_operand.vmem [shape: bf16[32,128], index: 2, kind: input, shape index: {}]   ;;  %s1064_s3 = inlined_call_operand.vmem [shape: f32[1,128], index: 3, kind: input, shape index: {}]   ;;  %s1065_s4 = inlined_call_operand.vmem [shape: bf16[32,32], index: 4, kind: input, shape index: {}]   ;;  %s1066_s5 = inlined_call_operand.vmem [shape: f32[1,32], index: 5, kind: input, shape index: {}]   ;;  %s1067_s6 = inlined_call_operand.vmem [shape: bf16[32,32], index: 6, kind: input, shape index: {}]   ;;  %s1068_s7 = inlined_call_operand.vmem [shape: f32[1,32], index: 7, kind: input, shape index: {}]   ;;  %s1069_s8 = inlined_call_operand.vmem [shape: f32[1,32], index: 8, kind: input, shape index: {}]   ;;  %s1070_s9 = inlined_call_operand.<no memory space> [shape: f32[1,1], index: 9, kind: input, shape index: {}]   ;;  %s1071_s10 = inlined_call_operand.hbm [shape: f32[2,32], index: 10, kind: output, shape index: {0}]   ;;  %s1072_s11 = inlined_call_operand.vmem [shape: f32[2,1], index: 11, kind: output, shape index: {1}]  }
   0x1   :  { %v17_v0 = vstv %s1070_s9 }
   0x2   :  { %18 = vst [vmem:[#allocation2] sm:$0x1] %v17_v0 }
   0x3   :  { %v800_v1 = vld [vmem:[%s1062_s1 + $0x8] sm:$0xff]  ;;  %v799_v3 = vld [vmem:[%s1062_s1] sm:$0xff] }
   0x4   :  { %v802_v2 = vld [vmem:[%s1063_s2 + $0x8] sm:$0xff]  ;;  %78 = vmatpush.bf16.msra.mxu0 %v800_v1  ;;  %v801_v4 = vld [vmem:[%s1063_s2] sm:$0xff] }
   0x5   :  { %111 = vmatpush.bf16.msra.mxu1 %v802_v2  ;;  %170 = vmatpush.bf16.msra.mxu2 %v802_v2 }
   0x6   :  { %236 = vmatpush.bf16.msra.mxu3 %v802_v2 }
   0x7   :  { %19 = vsyncpa [#allocation4], 0  ;;  %v798_v5 = vld [vmem:[%s1061_s0] sm:$0xff]  ;;  %vm68_vm0 = vcmask 261120   ;;  %v890_v6 = vmov 0   ;;  %s891_s2 = smov 32  }
   0x8   :  { %79 = vmatpush.bf16.msra.mxu0 %v799_v3  ;;  %v976_v7 = vld [vmem:[%s1064_s3] ss:$0 sm:$0xff]  ;;  %s892_s3 = smov 64   ;;  %s893_s18 = smov [#allocation3]  }
   0x9   :  { %112 = vmatpush.bf16.msra.mxu1 %v801_v4  ;;  %171 = vmatpush.bf16.msra.mxu2 %v801_v4  ;;  %s723_s21 = sshll.u32 %s1071_s10, 4  ;;  %s724_s21 = int_to_ptr.hbm [resolvable:$true] %s723_s21 }
   0xa   :  { %237 = vmatpush.bf16.msra.mxu3 %v801_v4 }
   0xb   :  { %748 = vmatmul.msk.bf16.vlgmr.msra.gmra.mxu0 %vm68_vm0, %v798_v5 }
   0xc   :  { %302 = vmatpush.bf16.msrb.mxu0 %v802_v2  ;;  %113 = vmatmul.bf16.vlgmr.msra.gmra.mxu1 %v890_v6 }
   0xd   :  { %368 = vmatpush.bf16.msrb.mxu1 %v802_v2  ;;  %430 = vmatpush.bf16.msrb.mxu2 %v802_v2 }
   0xe   :  { %496 = vmatpush.bf16.msrb.mxu3 %v802_v2 }
  0x10   :  { %303 = vmatpush.bf16.msrb.mxu0 %v801_v4 }
  0x11   :  { %369 = vmatpush.bf16.msrb.mxu1 %v801_v4  ;;  %431 = vmatpush.bf16.msrb.mxu2 %v801_v4 }
  0x12   :  { %497 = vmatpush.bf16.msrb.mxu3 %v801_v4 }
  0x14   :  { %562 = vmatpush.bf16.msra.mxu0 %v802_v2 }
  0x18   :  { %563 = vmatpush.bf16.msra.mxu0 %v801_v4 }
  0x88   :  { %v81_v8 = vpop.f32.mrf.mxu0 }
  0x89   :  { %v114_v9 = vpop.f32.mrf.mxu1  ;;  %v979_v10 = vadd.f32 %v976_v7, %v81_v8 }
  0x8b   :  { %v118_v11 = vadd.f32 %v114_v9, %v979_v10 }
  0x8d   :  { %v757_v12 = vmul.f32 -1.442695, %v118_v11 }
  0x8f   :  { %816 = vpow2.f32 %v757_v12 }
  0x91   :  { %v116_v13 = vpop.f32.mrf.mxu1 }
  0x95   :  { %v817_v14 = vpop.eup %816 }
  0x96   :  { %v122_v15 = vadd.f32 1.0, %v817_v14 }
  0x98   :  { %818 = vrcp.f32 %v122_v15  ;;  %v134_v19 = vand.u32 2147483648, %v122_v15  ;;  %v132_v21 = vand.u32 2147483647, %v122_v15  ;;  %vm128_vm2 = vweird.f32 %v122_v15 }
  0x9a   :  { %v135_v23 = vor.u32 1.1754944e-38, %v134_v19  ;;  %vm133_vm4 = vcmp.eq.f32.partialorder %v132_v21, 8.507059e+37 }
  0x9e   :  { %v819_v16 = vpop.eup %818 }
  0x9f   :  { %v124_v17 = vmul.f32 %v819_v16, %v122_v15  ;;  %vm129_vm1 = vweird.f32 %v819_v16 }
  0xa0   :  { %vm130_vm3 = vmor %vm128_vm2, %vm129_vm1 }
  0xa1   :  { %v125_v18 = vsub.f32 1.0, %v124_v17 }
  0xa3   :  { %v126_v20 = vmul.f32 %v819_v16, %v125_v18 }
  0xa5   :  { %v127_v22 = vadd.f32 %v819_v16, %v126_v20 }
  0xa7   :  { %v131_v24 = vsel %vm130_vm3, %v819_v16, %v127_v22 }
  0xa8   :  { %v136_v25 = vsel %vm133_vm4, %v135_v23, %v131_v24 }
  0xa9   :  { %v138_v26 = vmul.f32 2.0, %v136_v25  ;;  %v140_v30 = vmul.f32 0.0, %v136_v25 }
  0xab   :  { %v758_v27 = vadd.f32 -1.0, %v138_v26 }
  0xad   :  { %142 = vrot.lane.b32.xlu0 %v758_v27, %s891_s2 }
 0x11f   :  { %v143_v28 = vpop.permute.xlu0 %142 }
 0x120   :  { %v145_v29 = vmul.f32 %v143_v28, %v136_v25 }
 0x122   :  { %147 = vrot.lane.b32.xlu0 %v145_v29, %s891_s2 }
 0x194   :  { %v148_v31 = vpop.permute.xlu0 %147 }
 0x195   :  { %v150_v32 = vadd.f32 %v148_v31, %v140_v30 }
 0x197   :  { %820 = vtanh.f32 %v150_v32  ;;  %v203_v59 = vrot.slane %v150_v32, 6 }
 0x19d   :  { %v821_v33 = vpop.eup %820 }
 0x19e   :  { %153 = vrot.lane.b32.xlu1 %v821_v33, %s891_s2 }
 0x210   :  { %v154_v34 = vpop.permute.xlu1 %153 }
 0x211   :  { %v156_v35 = vmul.f32 %v154_v34, %v136_v25 }
 0x213   :  { %v157_v36 = vpack.c.bf16 %v156_v35, %v156_v35 }
 0x215   :  { %159 = vrot.lane.b32.xlu1 %v157_v36, %s892_s3 }
 0x287   :  { %v160_v37 = vpop.permute.xlu1 %159 }
 0x288   :  { %759 = vmatmul.msk.bf16.vlgmr.msra.gmra.mxu2 %vm68_vm0, %v160_v37 }
 0x30b   :  { %v173_v38 = vpop.f32.mrf.mxu2 }
 0x30c   :  { %v178_v39 = vrot.slane %v173_v38, 6  ;;  %v83_v38 = vpop.f32.mrf.mxu0 }
 0x30e   :  { %v180_v40 = vadd.f32 %v178_v39, %v979_v10 }
 0x310   :  { %v760_v41 = vmul.f32 -1.442695, %v180_v40 }
 0x312   :  { %822 = vpow2.f32 %v760_v41 }
 0x313   :  { %v175_v42 = vpop.f32.mrf.mxu2 }
 0x318   :  { %v823_v43 = vpop.eup %822 }
 0x319   :  { %v184_v44 = vadd.f32 1.0, %v823_v43 }
 0x31b   :  { %824 = vrcp.f32 %v184_v44  ;;  %v196_v48 = vand.u32 2147483648, %v184_v44  ;;  %v194_v50 = vand.u32 2147483647, %v184_v44  ;;  %vm190_vm6 = vweird.f32 %v184_v44 }
 0x31d   :  { %v197_v52 = vor.u32 1.1754944e-38, %v196_v48  ;;  %vm195_vm8 = vcmp.eq.f32.partialorder %v194_v50, 8.507059e+37 }
 0x321   :  { %v825_v45 = vpop.eup %824 }
 0x322   :  { %v186_v46 = vmul.f32 %v825_v45, %v184_v44  ;;  %vm191_vm5 = vweird.f32 %v825_v45 }
 0x323   :  { %vm192_vm7 = vmor %vm190_vm6, %vm191_vm5 }
 0x324   :  { %v187_v47 = vsub.f32 1.0, %v186_v46 }
 0x326   :  { %v188_v49 = vmul.f32 %v825_v45, %v187_v47 }
 0x328   :  { %v189_v51 = vadd.f32 %v825_v45, %v188_v49 }
 0x32a   :  { %v193_v53 = vsel %vm192_vm7, %v825_v45, %v189_v51 }
 0x32b   :  { %v198_v54 = vsel %vm195_vm8, %v197_v52, %v193_v53 }
 0x32c   :  { %v200_v55 = vmul.f32 2.0, %v198_v54  ;;  %v205_v60 = vmul.f32 %v203_v59, %v198_v54 }
 0x32e   :  { %v761_v56 = vadd.f32 -1.0, %v200_v55 }
 0x330   :  { %207 = vrot.lane.b32.xlu2 %v761_v56, %s891_s2 }
 0x38a   :  { %v208_v57 = vpop.permute.xlu2 %207 }
 0x38b   :  { %v210_v58 = vmul.f32 %v208_v57, %v198_v54 }
 0x38d   :  { %212 = vrot.lane.b32.xlu2 %v210_v58, %s891_s2 }
 0x3e7   :  { %v213_v61 = vpop.permute.xlu2 %212 }
 0x3e8   :  { %v215_v62 = vadd.f32 %v213_v61, %v205_v60 }
 0x3ea   :  { %826 = vtanh.f32 %v215_v62  ;;  %v269_v28 = vrot.slane %v215_v62, 6 }
 0x3f0   :  { %v827_v63 = vpop.eup %826 }
 0x3f1   :  { %218 = vrot.lane.b32.xlu0 %v827_v63, %s891_s2 }
 0x463   :  { %v219_v0 = vpop.permute.xlu0 %218 }
 0x464   :  { %v221_v1 = vmul.f32 %v219_v0, %v198_v54 }
 0x466   :  { %v222_v2 = vpack.c.bf16 %v221_v1, %v221_v1 }
 0x468   :  { %v224_v3 = vrot.slane %v222_v2, 1 }
 0x46a   :  { %225 = vrot.lane.b32.xlu1 %v224_v3, %s892_s3 }
 0x4dc   :  { %v226_v4 = vpop.permute.xlu1 %225 }
 0x4dd   :  { %762 = vmatmul.msk.bf16.vlgmr.msra.gmra.mxu3 %vm68_vm0, %v226_v4 }
 0x560   :  { %v239_v5 = vpop.f32.mrf.mxu3 }
 0x561   :  { %v244_v6 = vrot.slane %v239_v5, 4  ;;  %v1006_v5 = vadd.f32 %v976_v7, %v83_v38 }
 0x563   :  { %v246_v8 = vadd.f32 %v244_v6, %v979_v10 }
 0x565   :  { %v763_v9 = vmul.f32 -1.442695, %v246_v8 }
 0x567   :  { %828 = vpow2.f32 %v763_v9 }
 0x568   :  { %v241_v11 = vpop.f32.mrf.mxu3 }
 0x56d   :  { %v829_v12 = vpop.eup %828 }
 0x56e   :  { %v250_v13 = vadd.f32 1.0, %v829_v12 }
 0x570   :  { %830 = vrcp.f32 %v250_v13  ;;  %v262_v17 = vand.u32 2147483648, %v250_v13  ;;  %v260_v19 = vand.u32 2147483647, %v250_v13  ;;  %vm256_vm10 = vweird.f32 %v250_v13 }
 0x572   :  { %v263_v21 = vor.u32 1.1754944e-38, %v262_v17  ;;  %vm261_vm12 = vcmp.eq.f32.partialorder %v260_v19, 8.507059e+37 }
 0x576   :  { %v831_v14 = vpop.eup %830 }
 0x577   :  { %v252_v15 = vmul.f32 %v831_v14, %v250_v13  ;;  %vm257_vm9 = vweird.f32 %v831_v14 }
 0x578   :  { %vm258_vm11 = vmor %vm256_vm10, %vm257_vm9 }
 0x579   :  { %v253_v16 = vsub.f32 1.0, %v252_v15 }
 0x57b   :  { %v254_v18 = vmul.f32 %v831_v14, %v253_v16 }
 0x57d   :  { %v255_v20 = vadd.f32 %v831_v14, %v254_v18 }
 0x57f   :  { %v259_v22 = vsel %vm258_vm11, %v831_v14, %v255_v20 }
 0x580   :  { %v264_v23 = vsel %vm261_vm12, %v263_v21, %v259_v22 }
 0x581   :  { %v266_v24 = vmul.f32 2.0, %v264_v23  ;;  %v271_v29 = vmul.f32 %v269_v28, %v264_v23 }
 0x583   :  { %v764_v25 = vadd.f32 -1.0, %v266_v24 }
 0x585   :  { %273 = vrot.lane.b32.xlu2 %v764_v25, %s891_s2 }
 0x5df   :  { %v274_v26 = vpop.permute.xlu2 %273 }
 0x5e0   :  { %v276_v27 = vmul.f32 %v274_v26, %v264_v23 }
 0x5e2   :  { %278 = vrot.lane.b32.xlu0 %v276_v27, %s891_s2 }
 0x654   :  { %v279_v30 = vpop.permute.xlu0 %278 }
 0x655   :  { %v281_v31 = vadd.f32 %v279_v30, %v271_v29 }
 0x657   :  { %832 = vtanh.f32 %v281_v31  ;;  %v335_v59 = vrot.slane %v281_v31, 6 }
 0x65d   :  { %v833_v32 = vpop.eup %832 }
 0x65e   :  { %284 = vrot.lane.b32.xlu1 %v833_v32, %s891_s2 }
 0x6d0   :  { %v285_v33 = vpop.permute.xlu1 %284 }
 0x6d1   :  { %v287_v34 = vmul.f32 %v285_v33, %v264_v23 }
 0x6d3   :  { %v288_v35 = vpack.c.bf16 %v287_v34, %v287_v34 }
 0x6d5   :  { %v290_v36 = vrot.slane %v288_v35, 2 }
 0x6d7   :  { %291 = vrot.lane.b32.xlu2 %v290_v36, %s892_s3 }
 0x731   :  { %v292_v37 = vpop.permute.xlu2 %291 }
 0x732   :  { %765 = vmatmul.msk.bf16.vlgmr.msrb.gmra.mxu0 %vm68_vm0, %v292_v37 }
 0x7af   :  { %v305_v39 = vpop.f32.mrf.mxu0 }
 0x7b0   :  { %v310_v40 = vrot.slane %v305_v39, 2 }
 0x7b2   :  { %v312_v41 = vadd.f32 %v310_v40, %v979_v10 }
 0x7b4   :  { %v766_v42 = vmul.f32 -1.442695, %v312_v41 }
 0x7b6   :  { %834 = vpow2.f32 %v766_v42 }
 0x7b7   :  { %v307_v43 = vpop.f32.mrf.mxu0 }
 0x7bc   :  { %v835_v44 = vpop.eup %834 }
 0x7bd   :  { %v316_v45 = vadd.f32 1.0, %v835_v44 }
 0x7bf   :  { %836 = vrcp.f32 %v316_v45  ;;  %v328_v49 = vand.u32 2147483648, %v316_v45  ;;  %v326_v51 = vand.u32 2147483647, %v316_v45  ;;  %vm322_vm14 = vweird.f32 %v316_v45 }
 0x7c1   :  { %v329_v53 = vor.u32 1.1754944e-38, %v328_v49  ;;  %vm327_vm1 = vcmp.eq.f32.partialorder %v326_v51, 8.507059e+37 }
 0x7c5   :  { %v837_v46 = vpop.eup %836 }
 0x7c6   :  { %v318_v47 = vmul.f32 %v837_v46, %v316_v45  ;;  %vm323_vm13 = vweird.f32 %v837_v46 }
 0x7c7   :  { %vm324_vm15 = vmor %vm322_vm14, %vm323_vm13 }
 0x7c8   :  { %v319_v48 = vsub.f32 1.0, %v318_v47 }
 0x7ca   :  { %v320_v50 = vmul.f32 %v837_v46, %v319_v48 }
 0x7cc   :  { %v321_v52 = vadd.f32 %v837_v46, %v320_v50 }
 0x7ce   :  { %v325_v54 = vsel %vm324_vm15, %v837_v46, %v321_v52 }
 0x7cf   :  { %v330_v10 = vsel %vm327_vm1, %v329_v53, %v325_v54 }
 0x7d0   :  { %v332_v55 = vmul.f32 2.0, %v330_v10  ;;  %v337_v60 = vmul.f32 %v335_v59, %v330_v10 }
 0x7d2   :  { %v767_v56 = vadd.f32 -1.0, %v332_v55 }
 0x7d4   :  { %339 = vrot.lane.b32.xlu0 %v767_v56, %s891_s2 }
 0x846   :  { %v340_v57 = vpop.permute.xlu0 %339 }
 0x847   :  { %v342_v58 = vmul.f32 %v340_v57, %v330_v10 }
 0x849   :  { %344 = vrot.lane.b32.xlu1 %v342_v58, %s891_s2 }
 0x8bb   :  { %v345_v61 = vpop.permute.xlu1 %344 }
 0x8bc   :  { %v347_v62 = vadd.f32 %v345_v61, %v337_v60 }
 0x8be   :  { %838 = vtanh.f32 %v347_v62  ;;  %v398_v27 = vrot.slane %v347_v62, 6 }
 0x8c4   :  { %v839_v63 = vpop.eup %838 }
 0x8c5   :  { %350 = vrot.lane.b32.xlu2 %v839_v63, %s891_s2 }
 0x91f   :  { %v351_v0 = vpop.permute.xlu2 %350 }
 0x920   :  { %v353_v1 = vmul.f32 %v351_v0, %v330_v10 }
 0x922   :  { %v354_v2 = vpack.c.bf16 %v353_v1, %v353_v1 }
 0x924   :  { %v356_v3 = vrot.slane %v354_v2, 3 }
 0x926   :  { %357 = vrot.lane.b32.xlu0 %v356_v3, %s892_s3 }
 0x998   :  { %v358_v4 = vpop.permute.xlu0 %357 }
 0x999   :  { %768 = vmatmul.msk.bf16.vlgmr.msrb.gmra.mxu1 %vm68_vm0, %v358_v4 }
 0xa16   :  { %v371_v6 = vpop.f32.mrf.mxu1 }
 0xa17   :  { %v375_v8 = vadd.f32 %v371_v6, %v1006_v5 }
 0xa19   :  { %v769_v9 = vmul.f32 -1.442695, %v375_v8 }
 0xa1b   :  { %840 = vpow2.f32 %v769_v9 }
 0xa1e   :  { %v373_v11 = vpop.f32.mrf.mxu1 }
 0xa21   :  { %v841_v12 = vpop.eup %840 }
 0xa22   :  { %v379_v13 = vadd.f32 1.0, %v841_v12 }
 0xa24   :  { %842 = vrcp.f32 %v379_v13  ;;  %v391_v17 = vand.u32 2147483648, %v379_v13  ;;  %v389_v19 = vand.u32 2147483647, %v379_v13  ;;  %vm385_vm3 = vweird.f32 %v379_v13 }
 0xa26   :  { %v392_v7 = vor.u32 1.1754944e-38, %v391_v17  ;;  %vm390_vm5 = vcmp.eq.f32.partialorder %v389_v19, 8.507059e+37 }
 0xa2a   :  { %v843_v14 = vpop.eup %842 }
 0xa2b   :  { %v381_v15 = vmul.f32 %v843_v14, %v379_v13  ;;  %vm386_vm2 = vweird.f32 %v843_v14 }
 0xa2c   :  { %vm387_vm4 = vmor %vm385_vm3, %vm386_vm2  ;;  %vm618_vm3 = vcmask 261126  }
 0xa2d   :  { %v382_v16 = vsub.f32 1.0, %v381_v15 }
 0xa2f   :  { %v383_v18 = vmul.f32 %v843_v14, %v382_v16 }
 0xa31   :  { %v384_v20 = vadd.f32 %v843_v14, %v383_v18 }
 0xa33   :  { %v388_v21 = vsel %vm387_vm4, %v843_v14, %v384_v20  ;;  %vm714_vm4 = vcmask 1024  }
 0xa34   :  { %v393_v22 = vsel %vm390_vm5, %v392_v7, %v388_v21 }
 0xa35   :  { %v395_v23 = vmul.f32 2.0, %v393_v22  ;;  %v400_v28 = vmul.f32 %v398_v27, %v393_v22 }
 0xa37   :  { %v770_v24 = vadd.f32 -1.0, %v395_v23 }
 0xa39   :  { %402 = vrot.lane.b32.xlu1 %v770_v24, %s891_s2 }
 0xaab   :  { %v403_v25 = vpop.permute.xlu1 %402 }
 0xaac   :  { %v405_v26 = vmul.f32 %v403_v25, %v393_v22 }
 0xaae   :  { %407 = vrot.lane.b32.xlu2 %v405_v26, %s891_s2 }
 0xb08   :  { %v408_v29 = vpop.permute.xlu2 %407 }
 0xb09   :  { %v410_v30 = vadd.f32 %v408_v29, %v400_v28 }
 0xb0b   :  { %844 = vtanh.f32 %v410_v30  ;;  %v463_v56 = vrot.slane %v410_v30, 6 }
 0xb11   :  { %v845_v31 = vpop.eup %844 }
 0xb12   :  { %413 = vrot.lane.b32.xlu0 %v845_v31, %s891_s2 }
 0xb84   :  { %v414_v32 = vpop.permute.xlu0 %413 }
 0xb85   :  { %v416_v33 = vmul.f32 %v414_v32, %v393_v22 }
 0xb87   :  { %v417_v34 = vpack.c.bf16 %v416_v33, %v416_v33 }
 0xb89   :  { %419 = vrot.lane.b32.xlu1 %v417_v34, %s892_s3 }
 0xbfb   :  { %v420_v35 = vpop.permute.xlu1 %419 }
 0xbfc   :  { %771 = vmatmul.msk.bf16.vlgmr.msrb.gmra.mxu2 %vm68_vm0, %v420_v35 }
 0xc7f   :  { %v433_v36 = vpop.f32.mrf.mxu2 }
 0xc80   :  { %v438_v37 = vrot.slane %v433_v36, 6 }
 0xc82   :  { %v440_v38 = vadd.f32 %v438_v37, %v1006_v5 }
 0xc84   :  { %v772_v39 = vmul.f32 -1.442695, %v440_v38 }
 0xc86   :  { %846 = vpow2.f32 %v772_v39 }
 0xc87   :  { %v435_v40 = vpop.f32.mrf.mxu2 }
 0xc8c   :  { %v847_v41 = vpop.eup %846 }
 0xc8d   :  { %v444_v42 = vadd.f32 1.0, %v847_v41 }
 0xc8f   :  { %848 = vrcp.f32 %v444_v42  ;;  %v456_v46 = vand.u32 2147483648, %v444_v42  ;;  %v454_v48 = vand.u32 2147483647, %v444_v42  ;;  %vm450_vm7 = vweird.f32 %v444_v42 }
 0xc91   :  { %v457_v50 = vor.u32 1.1754944e-38, %v456_v46  ;;  %vm455_vm9 = vcmp.eq.f32.partialorder %v454_v48, 8.507059e+37 }
 0xc95   :  { %v849_v43 = vpop.eup %848 }
 0xc96   :  { %v446_v44 = vmul.f32 %v849_v43, %v444_v42  ;;  %vm451_vm6 = vweird.f32 %v849_v43 }
 0xc97   :  { %vm452_vm8 = vmor %vm450_vm7, %vm451_vm6 }
 0xc98   :  { %v447_v45 = vsub.f32 1.0, %v446_v44 }
 0xc9a   :  { %v448_v47 = vmul.f32 %v849_v43, %v447_v45 }
 0xc9c   :  { %v449_v49 = vadd.f32 %v849_v43, %v448_v47 }
 0xc9e   :  { %v453_v51 = vsel %vm452_vm8, %v849_v43, %v449_v49 }
 0xc9f   :  { %v458_v52 = vsel %vm455_vm9, %v457_v50, %v453_v51 }
 0xca0   :  { %v460_v53 = vmul.f32 2.0, %v458_v52  ;;  %v465_v57 = vmul.f32 %v463_v56, %v458_v52 }
 0xca2   :  { %v773_v54 = vadd.f32 -1.0, %v460_v53 }
 0xca4   :  { %467 = vrot.lane.b32.xlu2 %v773_v54, %s891_s2 }
 0xcfe   :  { %v468_v10 = vpop.permute.xlu2 %467 }
 0xcff   :  { %v470_v55 = vmul.f32 %v468_v10, %v458_v52 }
 0xd01   :  { %472 = vrot.lane.b32.xlu0 %v470_v55, %s891_s2 }
 0xd73   :  { %v473_v58 = vpop.permute.xlu0 %472 }
 0xd74   :  { %v475_v59 = vadd.f32 %v473_v58, %v465_v57 }
 0xd76   :  { %850 = vtanh.f32 %v475_v59  ;;  %v529_v25 = vrot.slane %v475_v59, 6  ;;  %v804_v59 = vld [vmem:[%s1065_s4 + $0x8] sm:$0xff] }
 0xd77   :  { %654 = vmatpush.bf16.msra.mxu1 %v804_v59 }
 0xd7c   :  { %v851_v60 = vpop.eup %850 }
 0xd7d   :  { %478 = vrot.lane.b32.xlu1 %v851_v60, %s891_s2  ;;  %v803_v60 = vld [vmem:[%s1065_s4] sm:$0xff] }
 0xd7e   :  { %655 = vmatpush.bf16.msra.mxu1 %v803_v60 }
 0xdef   :  { %v479_v61 = vpop.permute.xlu1 %478 }
 0xdf0   :  { %v481_v62 = vmul.f32 %v479_v61, %v458_v52 }
 0xdf2   :  { %v482_v63 = vpack.c.bf16 %v481_v62, %v481_v62 }
 0xdf4   :  { %v484_v0 = vrot.slane %v482_v63, 1 }
 0xdf6   :  { %485 = vrot.lane.b32.xlu2 %v484_v0, %s892_s3 }
 0xe50   :  { %v486_v1 = vpop.permute.xlu2 %485 }
 0xe51   :  { %774 = vmatmul.msk.bf16.vlgmr.msrb.gmra.mxu3 %vm68_vm0, %v486_v1  ;;  %v806_v1 = vld [vmem:[%s1067_s6 + $0x8] sm:$0xff] }
 0xe52   :  { %692 = vmatpush.bf16.msra.mxu2 %v806_v1 }
 0xed4   :  { %v499_v2 = vpop.f32.mrf.mxu3 }
 0xed5   :  { %v504_v3 = vrot.slane %v499_v2, 4  ;;  %v805_v2 = vld [vmem:[%s1067_s6] sm:$0xff]  ;;  %s721_s6 = sshll.u32 %s893_s18, 4  ;;  %s722_s6 = int_to_ptr.vmem [resolvable:$true] %s721_s6 }
 0xed6   :  { %693 = vmatpush.bf16.msra.mxu2 %v805_v2 }
 0xed7   :  { %v506_v4 = vadd.f32 %v504_v3, %v1006_v5 }
 0xed9   :  { %v775_v6 = vmul.f32 -1.442695, %v506_v4 }
 0xedb   :  { %852 = vpow2.f32 %v775_v6  ;;  %v812_v6 = vld [vmem:[%s1066_s5] ss:$0 sm:$0xff] }
 0xedc   :  { %v501_v8 = vpop.f32.mrf.mxu3 }
 0xee1   :  { %v853_v9 = vpop.eup %852 }
 0xee2   :  { %v510_v11 = vadd.f32 1.0, %v853_v9 }
 0xee4   :  { %854 = vrcp.f32 %v510_v11  ;;  %v522_v15 = vand.u32 2147483648, %v510_v11  ;;  %v520_v17 = vand.u32 2147483647, %v510_v11  ;;  %vm516_vm11 = vweird.f32 %v510_v11 }
 0xee6   :  { %v523_v19 = vor.u32 1.1754944e-38, %v522_v15  ;;  %vm521_vm13 = vcmp.eq.f32.partialorder %v520_v17, 8.507059e+37  ;;  %v814_v17 = vld [vmem:[%s1069_s8] ss:$0 sm:$0xff] }
 0xeea   :  { %v855_v12 = vpop.eup %854 }
 0xeeb   :  { %v512_v13 = vmul.f32 %v855_v12, %v510_v11  ;;  %vm517_vm10 = vweird.f32 %v855_v12 }
 0xeec   :  { %vm518_vm12 = vmor %vm516_vm11, %vm517_vm10 }
 0xeed   :  { %v513_v14 = vsub.f32 1.0, %v512_v13 }
 0xeef   :  { %v514_v16 = vmul.f32 %v855_v12, %v513_v14  ;;  %v813_v14 = vld [vmem:[%s1068_s7] ss:$0 sm:$0xff] }
 0xef1   :  { %v515_v18 = vadd.f32 %v855_v12, %v514_v16 }
 0xef3   :  { %v519_v20 = vsel %vm518_vm12, %v855_v12, %v515_v18 }
 0xef4   :  { %v524_v7 = vsel %vm521_vm13, %v523_v19, %v519_v20 }
 0xef5   :  { %v526_v21 = vmul.f32 2.0, %v524_v7  ;;  %v531_v26 = vmul.f32 %v529_v25, %v524_v7 }
 0xef7   :  { %v776_v22 = vadd.f32 -1.0, %v526_v21  ;;  %v815_v21 = vld [vmem:[#allocation2] ss:$0 sm:$0xff] }
 0xef9   :  { %533 = vrot.lane.b32.xlu0 %v776_v22, %s891_s2 }
 0xf6b   :  { %v534_v23 = vpop.permute.xlu0 %533 }
 0xf6c   :  { %v536_v24 = vmul.f32 %v534_v23, %v524_v7 }
 0xf6e   :  { %538 = vrot.lane.b32.xlu1 %v536_v24, %s891_s2 }
 0xfe0   :  { %v539_v27 = vpop.permute.xlu1 %538 }
 0xfe1   :  { %v541_v28 = vadd.f32 %v539_v27, %v531_v26 }
 0xfe3   :  { %856 = vtanh.f32 %v541_v28  ;;  %v595_v10 = vrot.slane %v541_v28, 6 }
 0xfe9   :  { %v857_v29 = vpop.eup %856 }
 0xfea   :  { %544 = vrot.lane.b32.xlu2 %v857_v29, %s891_s2 }
0x1044   :  { %v545_v30 = vpop.permute.xlu2 %544 }
0x1045   :  { %v547_v31 = vmul.f32 %v545_v30, %v524_v7 }
0x1047   :  { %v548_v32 = vpack.c.bf16 %v547_v31, %v547_v31 }
0x1049   :  { %v550_v33 = vrot.slane %v548_v32, 2 }
0x104b   :  { %551 = vrot.lane.b32.xlu0 %v550_v33, %s892_s3 }
0x10bd   :  { %v552_v34 = vpop.permute.xlu0 %551 }
0x10be   :  { %777 = vmatmul.msk.bf16.vlgmr.msra.gmra.mxu0 %vm68_vm0, %v552_v34 }
0x113b   :  { %v565_v35 = vpop.f32.mrf.mxu0 }
0x113c   :  { %v570_v36 = vrot.slane %v565_v35, 2 }
0x113e   :  { %v572_v37 = vadd.f32 %v570_v36, %v1006_v5 }
0x1140   :  { %v778_v38 = vmul.f32 -1.442695, %v572_v37 }
0x1142   :  { %858 = vpow2.f32 %v778_v38 }
0x1143   :  { %v567_v39 = vpop.f32.mrf.mxu0 }
0x1148   :  { %v859_v40 = vpop.eup %858 }
0x1149   :  { %v576_v41 = vadd.f32 1.0, %v859_v40 }
0x114b   :  { %860 = vrcp.f32 %v576_v41  ;;  %v588_v45 = vand.u32 2147483648, %v576_v41  ;;  %v586_v47 = vand.u32 2147483647, %v576_v41  ;;  %vm582_vm15 = vweird.f32 %v576_v41 }
0x114d   :  { %v589_v49 = vor.u32 1.1754944e-38, %v588_v45  ;;  %vm587_vm2 = vcmp.eq.f32.partialorder %v586_v47, 8.507059e+37 }
0x1151   :  { %v861_v42 = vpop.eup %860 }
0x1152   :  { %v578_v43 = vmul.f32 %v861_v42, %v576_v41  ;;  %vm583_vm14 = vweird.f32 %v861_v42 }
0x1153   :  { %vm584_vm1 = vmor %vm582_vm15, %vm583_vm14 }
0x1154   :  { %v579_v44 = vsub.f32 1.0, %v578_v43 }
0x1156   :  { %v580_v46 = vmul.f32 %v861_v42, %v579_v44 }
0x1158   :  { %v581_v48 = vadd.f32 %v861_v42, %v580_v46 }
0x115a   :  { %v585_v50 = vsel %vm584_vm1, %v861_v42, %v581_v48 }
0x115b   :  { %v590_v5 = vsel %vm587_vm2, %v589_v49, %v585_v50 }
0x115c   :  { %v592_v51 = vmul.f32 2.0, %v590_v5  ;;  %v597_v55 = vmul.f32 %v595_v10, %v590_v5 }
0x115e   :  { %v779_v52 = vadd.f32 -1.0, %v592_v51 }
0x1160   :  { %599 = vrot.lane.b32.xlu1 %v779_v52, %s891_s2 }
0x11d2   :  { %v600_v53 = vpop.permute.xlu1 %599 }
0x11d3   :  { %v602_v54 = vmul.f32 %v600_v53, %v590_v5 }
0x11d5   :  { %604 = vrot.lane.b32.xlu2 %v602_v54, %s891_s2 }
0x122f   :  { %v605_v56 = vpop.permute.xlu2 %604 }
0x1230   :  { %v607_v57 = vadd.f32 %v605_v56, %v597_v55 }
0x1232   :  { %862 = vtanh.f32 %v607_v57 }
0x1238   :  { %v863_v58 = vpop.eup %862 }
0x1239   :  { %610 = vrot.lane.b32.xlu0 %v863_v58, %s891_s2 }
0x12ab   :  { %v611_v61 = vpop.permute.xlu0 %610 }
0x12ac   :  { %v613_v62 = vmul.f32 %v611_v61, %v590_v5 }
0x12ae   :  { %v620_v63 = vpack.c.bf16 %v613_v62, %v613_v62  ;;  %615 = vrot.lane.b32.xlu0 %v613_v62, %s892_s3 }
0x12b0   :  { %v630_v0 = vrot.slane %v620_v63, 3 }
0x12b2   :  { %631 = vrot.lane.b32.xlu1 %v630_v0, %s892_s3 }
0x1320   :  { %v616_v3 = vpop.permute.xlu0 %615 }
0x1321   :  { %619 = vst.msk [vmem:[#allocation3 - $0x6] sm:$0xc0] %vm618_vm3, %v616_v3 }
0x1322   :  { %726 = dma.vmem_to_hbm [thread:$0]  %s722_s6, 32, %s724_s21, [#allocation4]  }
0x1324   :  { %v632_v4 = vpop.permute.xlu1 %631 }
0x1325   :  { %788 = vmatmul.msk.bf16.vlgmr.msra.gmra.mxu1 %vm68_vm0, %v632_v4 }
0x13a2   :  { %v657_v8 = vpop.f32.mrf.mxu1 }
0x13a3   :  { %v658_v9 = vadd.f32 %v812_v6, %v657_v8 }
0x13a5   :  { %v661_v11 = vmax.f32 %v658_v9, 0.0 }
0x13a7   :  { %v662_v12 = vpack.c.bf16 %v661_v11, %v661_v11 }
0x13a9   :  { %797 = vmatmul.msk.bf16.vlgmr.msra.gmra.mxu2 %vm68_vm0, %v662_v12  ;;  %vm705_vm0 = vcmask 254976  }
0x13aa   :  { %v659_v13 = vpop.f32.mrf.mxu1 }
0x142c   :  { %v695_v15 = vpop.f32.mrf.mxu2 }
0x142d   :  { %v696_v16 = vadd.f32 %v813_v14, %v695_v15 }
0x142f   :  { %v699_v18 = vmax.f32 %v696_v16, 0.0 }
0x1431   :  { %v704_v19 = vmul.f32 %v814_v17, %v699_v18 }
0x1433   :  { %v706_v20 = vsel %vm705_vm0, %v704_v19, 0.0 }
0x1434   :  { %v697_v7 = vpop.f32.mrf.mxu2  ;;  %707 = vadd.xlane.f32.xlu2 %v706_v20 }
0x14a7   :  { %v708_v22 = vpop.xlane.xlu2 %707 }
0x14a8   :  { %v713_v23 = vadd.f32 %v815_v21, %v708_v22 }
0x14aa   :  { %715 = vst.msk [vmem:[%s1072_s11] sm:$0x3] %vm714_vm4, %v713_v23 }
0x14ab   :  { %888 = dma.done.wait [#allocation4], 32  }
0x14ac   :  { %889 = vsyncadd [#allocation4], 4294967264 }
0x14ad   :  { %735 = vsyncpa [#allocation4], 1 }

</bundles_post_ra>
